<compile_context>
chip_gen: v5e
topology: v5e:2x2
jax: 0.10.0
libtpu: 0.0.40
codegen_flags: <defaults>
</compile_context>

<pallas_src>
import functools

import jax
import jax.numpy as jnp
from jax.experimental import pallas as pl
from jax.experimental.pallas import tpu as pltpu


def _postprocess_kernel(logits_ref, boxes_ref, scores_ref, boxes_out_ref,
                        *, img_w, img_h):
    # logits_ref:    (N, C) f32 — full logits; only column 0 is read (in VMEM).
    # boxes_ref:     (N, 4) f32 — (cx, cy, w, h) in [0, 1].
    # scores_ref:    (N, 1) f32 out.
    # boxes_out_ref: (N, 4) f32 out — (x1, y1, x2, y2) in pixels.

    # scores = sigmoid(logits[..., 0]); the column slice happens in VMEM.
    scores_ref[...] = jax.nn.sigmoid(logits_ref[:, 0:1])

    boxes = boxes_ref[...]
    dt = boxes.dtype

    ctr = boxes[:, 0:2]                                        # (N, 2): cx, cy
    wh = boxes[:, 2:4]                                         # (N, 2): w,  h

    # Per-lane [img_w, img_h] scale built from iota + scalar literals
    # (target_size is static) — nothing captured, no extra input DMA.
    lane = jax.lax.broadcasted_iota(jnp.int32, ctr.shape, 1)   # (N, 2)
    scale = jnp.where(lane == 0, img_w, img_h).astype(dt)

    half_wh = 0.5 * wh
    # Same op order as the reference: (ctr ± 0.5*wh) * scale.
    boxes_out_ref[:, 0:2] = (ctr - half_wh) * scale            # x1, y1
    boxes_out_ref[:, 2:4] = (ctr + half_wh) * scale            # x2, y2
    # TODO(synk): for large query counts (N >= 128) switch boxes to a (4, N)
    # lane-dense layout (transpose in the wrapper) to avoid masked stores.


@functools.partial(jax.jit, static_argnames=("target_size",))
def tracker_post_process(pred_logits, pred_boxes, target_size):
    """Pallas implementation of TrackerPostProcess.forward.

    Args:
      pred_logits: (N, C) float32
      pred_boxes:  (N, 4) float32, cxcywh in [0, 1]
      target_size: (img_h, img_w), static python numbers
    Returns:
      (scores (N,), boxes_xyxy_scaled (N, 4), labels (N,))
    """
    img_h, img_w = target_size
    N, C = pred_logits.shape
    out_dtype = pred_logits.dtype

    kernel = functools.partial(_postprocess_kernel,
                               img_w=float(img_w), img_h=float(img_h))

    bytes_accessed = 4 * (N * C + N * 4 + N * 1 + N * 4)
    cost = pl.CostEstimate(flops=10 * N, transcendentals=N,
                           bytes_accessed=bytes_accessed)

    # No grid: single invocation, whole arrays staged in VMEM (KB-scale
    # working set fits trivially on v5e/v6e/v7x; nothing to pipeline).
    scores2d, boxes_out = pl.pallas_call(
        kernel,
        out_shape=(
            jax.ShapeDtypeStruct((N, 1), out_dtype),
            jax.ShapeDtypeStruct((N, 4), pred_boxes.dtype),
        ),
        in_specs=[
            pl.BlockSpec(memory_space=pltpu.MemorySpace.VMEM),
            pl.BlockSpec(memory_space=pltpu.MemorySpace.VMEM),
        ],
        out_specs=(
            pl.BlockSpec(memory_space=pltpu.MemorySpace.VMEM),
            pl.BlockSpec(memory_space=pltpu.MemorySpace.VMEM),
        ),
        cost_estimate=cost,
    )(pred_logits, pred_boxes)

    scores = scores2d[:, 0]
    # labels = full_like(scores, 0) — a constant; left to XLA (broadcast of 0),
    # no kernel output / DMA needed.
    labels = jnp.zeros((N,), dtype=out_dtype)
    return scores, boxes_out, labels


def _reference(pred_logits, pred_boxes, target_size):
    img_h, img_w = target_size
    scores = jax.nn.sigmoid(pred_logits[..., 0])
    cx, cy, w, h = jnp.split(pred_boxes, 4, axis=-1)
    xyxy = jnp.concatenate([cx - 0.5 * w, cy - 0.5 * h,
                            cx + 0.5 * w, cy + 0.5 * h], axis=-1)
    scale = jnp.array([img_w, img_h, img_w, img_h], dtype=pred_boxes.dtype)
    boxes = xyxy * scale[None, :]
    labels = jnp.zeros_like(scores)
    return scores, boxes, labels


if __name__ == "__main__":
    key = jax.random.PRNGKey(0)
    k1, k2 = jax.random.split(key)

    N, C = 8, 4                       # 8 track queries, 4 classes (small synthetic)
    pred_logits = jax.random.normal(k1, (N, C), dtype=jnp.float32)
    pred_boxes = jax.random.uniform(k2, (N, 4), dtype=jnp.float32)  # cxcywh in [0,1)
    target_size = (480, 640)          # (img_h, img_w)

    scores, boxes, labels = tracker_post_process(pred_logits, pred_boxes, target_size)
    jax.block_until_ready((scores, boxes, labels))

    ref_scores, ref_boxes, ref_labels = _reference(pred_logits, pred_boxes, target_size)
    assert scores.shape == (N,) and boxes.shape == (N, 4) and labels.shape == (N,)
    assert jnp.allclose(scores, ref_scores, atol=1e-5, rtol=1e-5)
    assert jnp.allclose(boxes, ref_boxes, atol=1e-4, rtol=1e-5)
    assert jnp.allclose(labels, ref_labels)

    print("KERNEL_OK")
</pallas_src>

<mosaic_0001>
module attributes {stable_mosaic.version = 11 : i64} {
  func.func @_postprocess_kernel(%arg0: memref<8x4xf32, #tpu.memory_space<vmem>>, %arg1: memref<8x4xf32, #tpu.memory_space<vmem>>, %arg2: memref<8x1xf32, #tpu.memory_space<vmem>>, %arg3: memref<8x4xf32, #tpu.memory_space<vmem>>) attributes {dimension_semantics = [], scalar_prefetch = 0 : i64, scratch_operands = 0 : i64, tpu.core_type = #tpu.core_type<tc>} {
    %c0 = arith.constant 0 : index
    %c0_0 = arith.constant 0 : index
    %0 = vector.load %arg0[%c0, %c0_0] : memref<8x4xf32, #tpu.memory_space<vmem>>, vector<8x1xf32>
    %1 = arith.negf %0 : vector<8x1xf32>
    %2 = math.exp %1 : vector<8x1xf32>
    %cst = arith.constant 1.000000e+00 : f32
    %3 = vector.broadcast %cst : f32 to vector<8x1xf32>
    %4 = arith.addf %3, %2 : vector<8x1xf32>
    %5 = arith.divf %3, %4 : vector<8x1xf32>
    %c0_1 = arith.constant 0 : index
    %c0_2 = arith.constant 0 : index
    %6 = vector.load %arg2[%c0_1, %c0_2] : memref<8x1xf32, #tpu.memory_space<vmem>>, vector<8x1xf32>
    tpu.vector_store %arg2[%c0_1, %c0_2], %5 {strides = array<i32>} : memref<8x1xf32, #tpu.memory_space<vmem>>, vector<8x1xf32>,
    %c0_3 = arith.constant 0 : index
    %c0_4 = arith.constant 0 : index
    %7 = vector.load %arg1[%c0_3, %c0_4] : memref<8x4xf32, #tpu.memory_space<vmem>>, vector<8x4xf32>
    %8 = vector.extract_strided_slice %7 {offsets = [0, 0], sizes = [8, 2], strides = [1, 1]} : vector<8x4xf32> to vector<8x2xf32>
    %9 = vector.extract_strided_slice %7 {offsets = [0, 2], sizes = [8, 2], strides = [1, 1]} : vector<8x4xf32> to vector<8x2xf32>
    %10 = tpu.iota {dimensions = array<i32: 1>} : vector<8x2xi32>
    %c0_i32 = arith.constant 0 : i32
    %11 = vector.broadcast %c0_i32 : i32 to vector<8x2xi32>
    %12 = arith.cmpi eq, %10, %11 : vector<8x2xi32>
    %cst_5 = arith.constant 6.400000e+02 : f32
    %cst_6 = arith.constant 4.800000e+02 : f32
    %13 = vector.broadcast %cst_5 : f32 to vector<8x2xf32>
    %14 = vector.broadcast %cst_6 : f32 to vector<8x2xf32>
    %15 = arith.select %12, %13, %14 : vector<8x2xi1>, vector<8x2xf32>
    %cst_7 = arith.constant 5.000000e-01 : f32
    %16 = vector.broadcast %cst_7 : f32 to vector<8x2xf32>
    %17 = arith.mulf %16, %9 : vector<8x2xf32>
    %18 = arith.subf %8, %17 : vector<8x2xf32>
    %19 = arith.mulf %18, %15 : vector<8x2xf32>
    %c0_8 = arith.constant 0 : index
    %c0_9 = arith.constant 0 : index
    %20 = vector.load %arg3[%c0_8, %c0_9] : memref<8x4xf32, #tpu.memory_space<vmem>>, vector<8x2xf32>
    tpu.vector_store %arg3[%c0_8, %c0_9], %19 {strides = array<i32>} : memref<8x4xf32, #tpu.memory_space<vmem>>, vector<8x2xf32>,
    %21 = arith.addf %8, %17 : vector<8x2xf32>
    %22 = arith.mulf %21, %15 : vector<8x2xf32>
    %c0_10 = arith.constant 0 : index
    %c2 = arith.constant 2 : index
    %23 = vector.load %arg3[%c0_10, %c2] : memref<8x4xf32, #tpu.memory_space<vmem>>, vector<8x2xf32>
    tpu.vector_store %arg3[%c0_10, %c2], %22 {strides = array<i32>} : memref<8x4xf32, #tpu.memory_space<vmem>>, vector<8x2xf32>,
    return
  }
}

</mosaic_0001>

<bundles_post_ra>
// kernel: tracker_post_process.1
= control target key start
LH: loop header
LB: loop body
LE: loop exit
PB: predicated region body
PF: predicated region fallthrough
CT: control target
= control target key end

     0   :  { %s73_s14 = smov 126   ;;  %v36_v2 = vlaneseq  ;;  %v74_v4 = vmov 480.0   ;;  %vm47_vm1 = vcmask 15360   ;;  %s75_s15 = smov 2   ;;  %vm33_vm6 = vcmask 7168   ;;  %s111_s1 = inlined_call_operand.vmem [shape: f32[8,4], index: 1, kind: input, shape index: {}]   ;;  %s112_s3 = inlined_call_operand.vmem [shape: f32[8,4], index: 3, kind: output, shape index: {1}]   ;;  %s113_s0 = inlined_call_operand.vmem [shape: f32[8,4], index: 0, kind: input, shape index: {}]   ;;  %s114_s2 = inlined_call_operand.vmem [shape: f32[8,1], index: 2, kind: output, shape index: {0}]  }
   0x1   :  { %v35_v0 = vld [vmem:[%s111_s1] sm:$0xff]  ;;  %vm55_vm7 = vcmask 31760  }
   0x2   :  { %v40_v1 = vmul.f32 0.5, %v35_v0  ;;  %v37_v3 = vand.u32 127, %v36_v2  ;;  %v13_v11 = vld [vmem:[%s113_s0] sm:$0xff] }
   0x3   :  { %v65_v12 = vmul.f32 -1.442695, %v13_v11 }
   0x4   :  { %42 = vrot.lane.b32.xlu0 %v40_v1, %s73_s14  ;;  %vm38_vm0 = vcmp.eq.s32.totalorder %v37_v3, 0 }
   0x5   :  { %v39_v5 = vsel %vm38_vm0, 640.0, %v74_v4  ;;  %69 = vpow2.f32 %v65_v12 }
   0xb   :  { %v70_v13 = vpop.eup %69 }
   0xc   :  { %v17_v14 = vadd.f32 1.0, %v70_v13 }
   0xe   :  { %71 = vrcp.f32 %v17_v14  ;;  %v29_v19 = vand.u32 2147483648, %v17_v14  ;;  %vm23_vm2 = vweird.f32 %v17_v14  ;;  %v27_v21 = vand.u32 2147483647, %v17_v14 }
  0x10   :  { %v30_v22 = vor.u32 1.1754944e-38, %v29_v19  ;;  %vm28_vm5 = vcmp.eq.f32.partialorder %v27_v21, 8.507059e+37 }
  0x14   :  { %v72_v15 = vpop.eup %71 }
  0x15   :  { %v19_v16 = vmul.f32 %v72_v15, %v17_v14  ;;  %vm24_vm3 = vweird.f32 %v72_v15 }
  0x16   :  { %vm25_vm4 = vmor %vm23_vm2, %vm24_vm3 }
  0x17   :  { %v20_v17 = vsub.f32 1.0, %v19_v16 }
  0x19   :  { %v21_v18 = vmul.f32 %v72_v15, %v20_v17 }
  0x1b   :  { %v22_v20 = vadd.f32 %v72_v15, %v21_v18 }
  0x1d   :  { %v26_v23 = vsel %vm25_vm4, %v72_v15, %v22_v20 }
  0x1e   :  { %v31_v24 = vsel %vm28_vm5, %v30_v22, %v26_v23 }
  0x1f   :  { %34 = vst.msk [vmem:[%s114_s2] sm:$0xff] %vm33_vm6, %v31_v24 }
  0x76   :  { %v43_v6 = vpop.permute.xlu0 %42 }
  0x77   :  { %v45_v7 = vsub.f32 %v35_v0, %v43_v6  ;;  %v49_v8 = vadd.f32 %v43_v6, %v35_v0 }
  0x79   :  { %v46_v9 = vmul.f32 %v45_v7, %v39_v5  ;;  %v50_v10 = vmul.f32 %v49_v8, %v39_v5 }
  0x7b   :  { %52 = vrot.lane.b32.xlu0 %v50_v10, %s75_s15  ;;  %48 = vst.msk [vmem:[%s112_s3] sm:$0xff] %vm47_vm1, %v46_v9 }
  0xed   :  { %v53_v25 = vpop.permute.xlu0 %52 }
  0xee   :  { %56 = vst.msk [vmem:[%s112_s3] sm:$0xff] %vm55_vm7, %v53_v25 }

</bundles_post_ra>
